<compile_context>
chip_gen: v5e
topology: v5e:2x2
jax: 0.10.0
libtpu: 0.0.40
codegen_flags: <defaults>
</compile_context>

<pallas_src>
import functools

import jax
import jax.numpy as jnp
import numpy as np
from jax import lax
from jax.experimental import pallas as pl
from jax.experimental.pallas import tpu as pltpu

HIDDEN = 400        # hard-coded in the module: NewSGConv(num_classes=400)
NUM_CLASSES = 2     # hard-coded in the module: nn.Linear(400, 2)
HIDDEN_PAD = 512    # 400 -> 4*128 lanes (zero padded, numerically inert)
OUT_PAD = 128       # 2 -> 128 lanes so the output store is lane-dense


def _rgnn_kernel(w_ref, x_ref, lw_ref, lb_ref, fw_ref, fb_ref, o_ref, *, B, N):
    # --- symmetric normalization (NewSGConv.norm), computed ONCE ------------
    W = w_ref[...]                                            # (N, N), symmetric
    deg_r = jnp.sum(jnp.abs(W), axis=1, keepdims=True)        # (N, 1)
    deg_c = jnp.sum(jnp.abs(W), axis=0, keepdims=True)        # (1, N) == deg_r.T by symmetry
    dinv_r = jnp.where(deg_r > 0.0, lax.rsqrt(deg_r), 0.0)    # inf -> 0
    dinv_c = jnp.where(deg_c > 0.0, lax.rsqrt(deg_c), 0.0)
    A = dinv_r * W * dinv_c                                   # (N, N)
    # K = 2 propagation matrix, shared across the whole batch.
    A2 = jnp.dot(A, A, preferred_element_type=jnp.float32)    # (N, N)

    X = x_ref[...]                                            # (B*N, F), batch-flattened
    lw = lw_ref[...]                                          # (F, HIDDEN_PAD)
    lb = lb_ref[...]                                          # (1, HIDDEN_PAD)
    fw = fw_ref[...]                                          # (HIDDEN_PAD, OUT_PAD)
    fb = fb_ref[...]                                          # (1, OUT_PAD)

    # --- per-batch propagate -> project -> ReLU -> pool -> classifier -------
    for b in range(B):                                        # B tiny -> fully unrolled
        # Propagate in the narrow F-dim space (cheap), then project once.
        xp = jnp.dot(A2, X[b * N:(b + 1) * N, :],
                     preferred_element_type=jnp.float32)      # (N, F)
        h = jnp.dot(xp, lw, preferred_element_type=jnp.float32)  # (N, HIDDEN_PAD)
        h = jnp.maximum(h + lb, 0.0)                          # ReLU
        pooled = jnp.sum(h, axis=0, keepdims=True)            # (1, HIDDEN_PAD) global_add_pool
        # TODO(synk): F.dropout(p=0.7) only applies in training; eval = identity.
        out_b = jnp.dot(pooled, fw,
                        preferred_element_type=jnp.float32) + fb
        o_ref[pl.ds(b, 1), :] = out_b                         # lane-dense (1, 128) row store


@jax.jit
def rgnn_forward(X, W_sym, lin_w, lin_b, fc_w, fc_b):
    """X: (B, N, F) float32.  Returns (B, NUM_CLASSES) float32."""
    B, N, F = X.shape
    X_flat = X.reshape(B * N, F)

    # Zero-pad weights/biases to lane-aligned widths (inert through relu/pool/fc).
    lw_pad = jnp.zeros((F, HIDDEN_PAD), jnp.float32).at[:, :HIDDEN].set(jnp.asarray(lin_w).T)
    lb_pad = jnp.zeros((1, HIDDEN_PAD), jnp.float32).at[:, :HIDDEN].set(
        jnp.asarray(lin_b).reshape(1, HIDDEN))
    fw_pad = jnp.zeros((HIDDEN_PAD, OUT_PAD), jnp.float32).at[:HIDDEN, :NUM_CLASSES].set(
        jnp.asarray(fc_w).T)
    fb_pad = jnp.zeros((1, OUT_PAD), jnp.float32).at[:, :NUM_CLASSES].set(
        jnp.asarray(fc_b).reshape(1, NUM_CLASSES))

    kernel = functools.partial(_rgnn_kernel, B=B, N=N)

    out_pad = pl.pallas_call(
        kernel,
        out_shape=jax.ShapeDtypeStruct((B, OUT_PAD), jnp.float32),
        # Single grid step: the entire working set fits in VMEM, so all
        # per-step pipeline overhead is amortized away.
        # TODO(synk): for large B, switch back to a batch grid axis with
        # dimension_semantics=("parallel",) so v7x's two TensorCores both work.
        grid=(1,),
        in_specs=[
            pl.BlockSpec((N, N), lambda i: (0, 0)),                  # W (symmetric)
            pl.BlockSpec((B * N, F), lambda i: (0, 0)),              # X, batch-flattened
            pl.BlockSpec((F, HIDDEN_PAD), lambda i: (0, 0)),         # lin weight^T (padded)
            pl.BlockSpec((1, HIDDEN_PAD), lambda i: (0, 0)),         # lin bias (padded)
            pl.BlockSpec((HIDDEN_PAD, OUT_PAD), lambda i: (0, 0)),   # fc weight^T (padded)
            pl.BlockSpec((1, OUT_PAD), lambda i: (0, 0)),            # fc bias (padded)
        ],
        out_specs=pl.BlockSpec((B, OUT_PAD), lambda i: (0, 0)),
        compiler_params=pltpu.CompilerParams(
            dimension_semantics=("arbitrary",)),
    )(W_sym, X_flat, lw_pad, lb_pad, fw_pad, fb_pad)

    # Slice the lane padding off (fused under jit).
    return out_pad[:, :NUM_CLASSES]


def _reference(X, W_sym, lin_w, lin_b, fc_w, fc_b):
    deg = jnp.sum(jnp.abs(W_sym), axis=1, keepdims=True)
    dinv = jnp.where(deg > 0.0, 1.0 / jnp.sqrt(deg), 0.0)
    A = dinv * W_sym * dinv.reshape(1, -1)
    x = jnp.einsum("ij,bjf->bif", A, jnp.einsum("ij,bjf->bif", A, X))
    h = jnp.maximum(x @ lin_w.T + lin_b, 0.0)
    pooled = jnp.sum(h, axis=1)
    return pooled @ fc_w.T + fc_b


if __name__ == "__main__":
    B, N, F = 2, 16, 8   # batch, num_nodes, input_dim (small, consistent shapes)

    key = jax.random.PRNGKey(0)
    k_x, k_e, k_lw, k_lb, k_fw, k_fb = jax.random.split(key, 6)

    # Input X: (B, N, F) — X2 / padding_masks are unused by the forward pass.
    X = jax.random.normal(k_x, (B, N, F), dtype=jnp.float32)

    # Learnable lower-triangular edge weights -> symmetric (N, N) matrix
    # (stand-in for the montage-derived weights; deterministic synthetic init).
    xs, ys = np.tril_indices(N)
    tril_vals = jax.random.uniform(k_e, (len(xs),), dtype=jnp.float32)
    W = jnp.zeros((N, N), dtype=jnp.float32).at[xs, ys].set(tril_vals)
    W_sym = W + W.T - jnp.diag(jnp.diag(W))

    # SGConv linear: Linear(input_dim, 400); classifier: Linear(400, 2)
    lin_w = jax.random.normal(k_lw, (HIDDEN, F), dtype=jnp.float32) * 0.05
    lin_b = jax.random.normal(k_lb, (HIDDEN,), dtype=jnp.float32) * 0.05
    fc_w = jax.random.normal(k_fw, (NUM_CLASSES, HIDDEN), dtype=jnp.float32) * 0.05
    fc_b = jax.random.normal(k_fb, (NUM_CLASSES,), dtype=jnp.float32) * 0.05

    out = rgnn_forward(X, W_sym, lin_w, lin_b, fc_w, fc_b)
    out = jax.block_until_ready(out)

    ref = _reference(X, W_sym, lin_w, lin_b, fc_w, fc_b)
    np.testing.assert_allclose(np.asarray(out), np.asarray(ref), rtol=1e-3, atol=1e-3)

    assert out.shape == (B, NUM_CLASSES)
    print("KERNEL_OK")
</pallas_src>

<mosaic_0001>
module attributes {stable_mosaic.version = 11 : i64} {
  func.func @_rgnn_kernel(%arg0: i32, %arg1: memref<16x16xf32, #tpu.memory_space<vmem>>, %arg2: memref<32x8xf32, #tpu.memory_space<vmem>>, %arg3: memref<8x512xf32, #tpu.memory_space<vmem>>, %arg4: memref<1x512xf32, #tpu.memory_space<vmem>>, %arg5: memref<512x128xf32, #tpu.memory_space<vmem>>, %arg6: memref<1x128xf32, #tpu.memory_space<vmem>>, %arg7: memref<2x128xf32, #tpu.memory_space<vmem>>) attributes {dimension_semantics = [#tpu.dimension_semantics<arbitrary>], iteration_bounds = array<i64: 1>, scalar_prefetch = 0 : i64, scratch_operands = 0 : i64, tpu.core_type = #tpu.core_type<tc>, window_params = [{pipeline_mode = #tpu.pipeline_mode<synchronous>, transform_indices = @transform_0, window_bounds = array<i64: 16, 16>}, {pipeline_mode = #tpu.pipeline_mode<synchronous>, transform_indices = @transform_1, window_bounds = array<i64: 32, 8>}, {pipeline_mode = #tpu.pipeline_mode<synchronous>, transform_indices = @transform_2, window_bounds = array<i64: 8, 512>}, {pipeline_mode = #tpu.pipeline_mode<synchronous>, transform_indices = @transform_3, window_bounds = array<i64: 1, 512>}, {pipeline_mode = #tpu.pipeline_mode<synchronous>, transform_indices = @transform_4, window_bounds = array<i64: 512, 128>}, {pipeline_mode = #tpu.pipeline_mode<synchronous>, transform_indices = @transform_5, window_bounds = array<i64: 1, 128>}, {pipeline_mode = #tpu.pipeline_mode<synchronous>, transform_indices = @transform_6, window_bounds = array<i64: 2, 128>}]} {
    %c0 = arith.constant 0 : index
    %c0_0 = arith.constant 0 : index
    %0 = vector.load %arg1[%c0, %c0_0] : memref<16x16xf32, #tpu.memory_space<vmem>>, vector<16x16xf32>
    %1 = math.absf %0 : vector<16x16xf32>
    %cst = arith.constant dense<0.000000e+00> : vector<16xf32>
    %2 = vector.multi_reduction <add>, %1, %cst [1] : vector<16x16xf32> to vector<16xf32>
    %3 = vector.shape_cast %2 : vector<16xf32> to vector<16x1xf32>
    %4 = math.absf %0 : vector<16x16xf32>
    %cst_1 = arith.constant dense<0.000000e+00> : vector<16xf32>
    %5 = vector.multi_reduction <add>, %4, %cst_1 [0] : vector<16x16xf32> to vector<16xf32>
    %6 = vector.shape_cast %5 : vector<16xf32> to vector<1x16xf32>
    %cst_2 = arith.constant 0.000000e+00 : f32
    %7 = vector.broadcast %cst_2 : f32 to vector<16x1xf32>
    %8 = arith.cmpf ogt, %3, %7 : vector<16x1xf32>
    %9 = math.rsqrt %3 : vector<16x1xf32>
    %cst_3 = arith.constant 0.000000e+00 : f32
    %10 = vector.broadcast %cst_3 : f32 to vector<16x1xf32>
    %11 = arith.select %8, %9, %10 : vector<16x1xi1>, vector<16x1xf32>
    %cst_4 = arith.constant 0.000000e+00 : f32
    %12 = vector.broadcast %cst_4 : f32 to vector<1x16xf32>
    %13 = arith.cmpf ogt, %6, %12 : vector<1x16xf32>
    %14 = math.rsqrt %6 : vector<1x16xf32>
    %cst_5 = arith.constant 0.000000e+00 : f32
    %15 = vector.broadcast %cst_5 : f32 to vector<1x16xf32>
    %16 = arith.select %13, %14, %15 : vector<1x16xi1>, vector<1x16xf32>
    %17 = vector.broadcast %11 : vector<16x1xf32> to vector<16x16xf32>
    %18 = arith.mulf %17, %0 : vector<16x16xf32>
    %19 = vector.broadcast %16 : vector<1x16xf32> to vector<16x16xf32>
    %20 = arith.mulf %18, %19 : vector<16x16xf32>
    %cst_6 = arith.constant dense<0.000000e+00> : vector<16x16xf32>
    %21 = tpu.matmul %20, %20, %cst_6 {dimension_numbers = #tpu.dot_dimension_numbers<[1], [0], [0], [1], [0, 0, 1, 1], [], []>} : vector<16x16xf32>, vector<16x16xf32>, vector<16x16xf32> -> vector<16x16xf32>
    %c0_7 = arith.constant 0 : index
    %c0_8 = arith.constant 0 : index
    %22 = vector.load %arg2[%c0_7, %c0_8] : memref<32x8xf32, #tpu.memory_space<vmem>>, vector<32x8xf32>
    %c0_9 = arith.constant 0 : index
    %c0_10 = arith.constant 0 : index
    %23 = vector.load %arg3[%c0_9, %c0_10] : memref<8x512xf32, #tpu.memory_space<vmem>>, vector<8x512xf32>
    %c0_11 = arith.constant 0 : index
    %c0_12 = arith.constant 0 : index
    %24 = vector.load %arg4[%c0_11, %c0_12] : memref<1x512xf32, #tpu.memory_space<vmem>>, vector<1x512xf32>
    %c0_13 = arith.constant 0 : index
    %c0_14 = arith.constant 0 : index
    %25 = vector.load %arg5[%c0_13, %c0_14] : memref<512x128xf32, #tpu.memory_space<vmem>>, vector<512x128xf32>
    %c0_15 = arith.constant 0 : index
    %c0_16 = arith.constant 0 : index
    %26 = vector.load %arg6[%c0_15, %c0_16] : memref<1x128xf32, #tpu.memory_space<vmem>>, vector<1x128xf32>
    %27 = vector.extract_strided_slice %22 {offsets = [0, 0], sizes = [16, 8], strides = [1, 1]} : vector<32x8xf32> to vector<16x8xf32>
    %cst_17 = arith.constant dense<0.000000e+00> : vector<16x8xf32>
    %28 = tpu.matmul %21, %27, %cst_17 {dimension_numbers = #tpu.dot_dimension_numbers<[1], [0], [0], [1], [0, 0, 1, 1], [], []>} : vector<16x16xf32>, vector<16x8xf32>, vector<16x8xf32> -> vector<16x8xf32>
    %cst_18 = arith.constant dense<0.000000e+00> : vector<16x512xf32>
    %29 = tpu.matmul %28, %23, %cst_18 {dimension_numbers = #tpu.dot_dimension_numbers<[1], [0], [0], [1], [0, 0, 1, 1], [], []>} : vector<16x8xf32>, vector<8x512xf32>, vector<16x512xf32> -> vector<16x512xf32>
    %30 = vector.broadcast %24 : vector<1x512xf32> to vector<16x512xf32>
    %31 = arith.addf %29, %30 : vector<16x512xf32>
    %cst_19 = arith.constant 0.000000e+00 : f32
    %32 = vector.broadcast %cst_19 : f32 to vector<16x512xf32>
    %33 = arith.maximumf %31, %32 : vector<16x512xf32>
    %cst_20 = arith.constant dense<0.000000e+00> : vector<512xf32>
    %34 = vector.multi_reduction <add>, %33, %cst_20 [0] : vector<16x512xf32> to vector<512xf32>
    %35 = vector.shape_cast %34 : vector<512xf32> to vector<1x512xf32>
    %cst_21 = arith.constant dense<0.000000e+00> : vector<1x128xf32>
    %36 = tpu.matmul %35, %25, %cst_21 {dimension_numbers = #tpu.dot_dimension_numbers<[1], [0], [0], [1], [0, 0, 1, 1], [], []>} : vector<1x512xf32>, vector<512x128xf32>, vector<1x128xf32> -> vector<1x128xf32>
    %37 = arith.addf %36, %26 : vector<1x128xf32>
    %c0_22 = arith.constant 0 : index
    %c0_23 = arith.constant 0 : index
    %38 = vector.load %arg7[%c0_22, %c0_23] : memref<2x128xf32, #tpu.memory_space<vmem>>, vector<1x128xf32>
    tpu.vector_store %arg7[%c0_22, %c0_23], %37 {strides = array<i32>} : memref<2x128xf32, #tpu.memory_space<vmem>>, vector<1x128xf32>,
    %39 = vector.extract_strided_slice %22 {offsets = [16, 0], sizes = [16, 8], strides = [1, 1]} : vector<32x8xf32> to vector<16x8xf32>
    %cst_24 = arith.constant dense<0.000000e+00> : vector<16x8xf32>
    %40 = tpu.matmul %21, %39, %cst_24 {dimension_numbers = #tpu.dot_dimension_numbers<[1], [0], [0], [1], [0, 0, 1, 1], [], []>} : vector<16x16xf32>, vector<16x8xf32>, vector<16x8xf32> -> vector<16x8xf32>
    %cst_25 = arith.constant dense<0.000000e+00> : vector<16x512xf32>
    %41 = tpu.matmul %40, %23, %cst_25 {dimension_numbers = #tpu.dot_dimension_numbers<[1], [0], [0], [1], [0, 0, 1, 1], [], []>} : vector<16x8xf32>, vector<8x512xf32>, vector<16x512xf32> -> vector<16x512xf32>
    %42 = vector.broadcast %24 : vector<1x512xf32> to vector<16x512xf32>
    %43 = arith.addf %41, %42 : vector<16x512xf32>
    %cst_26 = arith.constant 0.000000e+00 : f32
    %44 = vector.broadcast %cst_26 : f32 to vector<16x512xf32>
    %45 = arith.maximumf %43, %44 : vector<16x512xf32>
    %cst_27 = arith.constant dense<0.000000e+00> : vector<512xf32>
    %46 = vector.multi_reduction <add>, %45, %cst_27 [0] : vector<16x512xf32> to vector<512xf32>
    %47 = vector.shape_cast %46 : vector<512xf32> to vector<1x512xf32>
    %cst_28 = arith.constant dense<0.000000e+00> : vector<1x128xf32>
    %48 = tpu.matmul %47, %25, %cst_28 {dimension_numbers = #tpu.dot_dimension_numbers<[1], [0], [0], [1], [0, 0, 1, 1], [], []>} : vector<1x512xf32>, vector<512x128xf32>, vector<1x128xf32> -> vector<1x128xf32>
    %49 = arith.addf %48, %26 : vector<1x128xf32>
    %c1 = arith.constant 1 : index
    %c0_29 = arith.constant 0 : index
    %50 = vector.load %arg7[%c1, %c0_29] : memref<2x128xf32, #tpu.memory_space<vmem>>, vector<1x128xf32>
    tpu.vector_store %arg7[%c1, %c0_29], %49 {strides = array<i32>} : memref<2x128xf32, #tpu.memory_space<vmem>>, vector<1x128xf32>,
    return
  }
  func.func @transform_0(%arg0: i32) -> (i32, i32) {
    %c0_i32 = arith.constant 0 : i32
    %c0_i32_0 = arith.constant 0 : i32
    %c0_i32_1 = arith.constant 0 : i32
    return %c0_i32, %c0_i32_0 : i32, i32
  }
  func.func @transform_1(%arg0: i32) -> (i32, i32) {
    %c0_i32 = arith.constant 0 : i32
    %c0_i32_0 = arith.constant 0 : i32
    %c0_i32_1 = arith.constant 0 : i32
    return %c0_i32, %c0_i32_0 : i32, i32
  }
  func.func @transform_2(%arg0: i32) -> (i32, i32) {
    %c0_i32 = arith.constant 0 : i32
    %c0_i32_0 = arith.constant 0 : i32
    %c0_i32_1 = arith.constant 0 : i32
    return %c0_i32, %c0_i32_0 : i32, i32
  }
  func.func @transform_3(%arg0: i32) -> (i32, i32) {
    %c0_i32 = arith.constant 0 : i32
    %c0_i32_0 = arith.constant 0 : i32
    %c0_i32_1 = arith.constant 0 : i32
    return %c0_i32, %c0_i32_0 : i32, i32
  }
  func.func @transform_4(%arg0: i32) -> (i32, i32) {
    %c0_i32 = arith.constant 0 : i32
    %c0_i32_0 = arith.constant 0 : i32
    %c0_i32_1 = arith.constant 0 : i32
    return %c0_i32, %c0_i32_0 : i32, i32
  }
  func.func @transform_5(%arg0: i32) -> (i32, i32) {
    %c0_i32 = arith.constant 0 : i32
    %c0_i32_0 = arith.constant 0 : i32
    %c0_i32_1 = arith.constant 0 : i32
    return %c0_i32, %c0_i32_0 : i32, i32
  }
  func.func @transform_6(%arg0: i32) -> (i32, i32) {
    %c0_i32 = arith.constant 0 : i32
    %c0_i32_0 = arith.constant 0 : i32
    %c0_i32_1 = arith.constant 0 : i32
    return %c0_i32, %c0_i32_0 : i32, i32
  }
}

</mosaic_0001>

<bundles_post_ra>
// kernel: rgnn_forward.1
= control target key start
LH: loop header
LB: loop body
LE: loop exit
PB: predicated region body
PF: predicated region fallthrough
CT: control target
= control target key end

     0   :  { %vm28_vm0 = vcmask 130048   ;;  %s1349_s0 = inlined_call_operand.vmem [shape: f32[16,16], index: 0, kind: input, shape index: {}]   ;;  %s1350_s1 = inlined_call_operand.vmem [shape: f32[32,8], index: 1, kind: input, shape index: {}]   ;;  %s1351_s2 = inlined_call_operand.vmem [shape: f32[8,512], index: 2, kind: input, shape index: {}]   ;;  %s1352_s3 = inlined_call_operand.vmem [shape: f32[1,512], index: 3, kind: input, shape index: {}]   ;;  %s1353_s4 = inlined_call_operand.vmem [shape: f32[512,128], index: 4, kind: input, shape index: {}]   ;;  %s1354_s5 = inlined_call_operand.vmem [shape: f32[1,128], index: 5, kind: input, shape index: {}]   ;;  %s1355_s6 = inlined_call_operand.hbm [shape: f32[2,128], index: 6, kind: output, shape index: {}]  }
   0x1   :  { %v25_v0 = vld [vmem:[%s1349_s0 + $0x8] sm:$0xff]  ;;  %v24_v1 = vld [vmem:[%s1349_s0] sm:$0xff] }
   0x2   :  { %11 = vsyncpa [#allocation3], 0  ;;  %v27_v2 = vand.u32 2147483647, %v25_v0  ;;  %v26_v3 = vand.u32 2147483647, %v24_v1 }
   0x3   :  { %v112_v22 = vld [vmem:[%s1350_s1 + $0x8] sm:$0xff]  ;;  %v111_v44 = vld [vmem:[%s1350_s1] sm:$0xff]  ;;  %v825_v49 = vld [vmem:[%s1351_s2 + $0x10] sm:$0xff]  ;;  %vm223_vm13 = vcmask 64512  }
   0x4   :  { %v32_v4 = vsel %vm28_vm0, %v27_v2, 0.0  ;;  %v29_v5 = vsel %vm28_vm0, %v26_v3, 0.0  ;;  %205 = vmatpush.msra.mxu1 %v112_v22  ;;  %v813_v47 = vld [vmem:[%s1351_s2] sm:$0xff]  ;;  %v818_v48 = vld [vmem:[%s1351_s2 + $0x8] sm:$0xff]  ;;  %v830_v50 = vld [vmem:[%s1351_s2 + $0x18] sm:$0xff]  ;;  %s684_s2 = sshll.u32 %s1355_s6, 4  ;;  %s685_s2 = int_to_ptr.hbm [resolvable:$true] %s684_s2 }
   0x5   :  { %33 = vadd.xlane.f32.xlu0 %v32_v4  ;;  %v35_v6 = vadd.f32 %v32_v4, %v29_v5  ;;  %245 = vmatpush.msra.mxu2 %v813_v47  ;;  %v837_v51 = vld [vmem:[%s1353_s4 + $0x78] sm:$0xff]  ;;  %v847_v53 = vld [vmem:[%s1353_s4 + $0x70] sm:$0xff]  ;;  %v869_v57 = vld [vmem:[%s1353_s4 + $0x68] sm:$0xff] }
   0x6   :  { %206 = vmatpush.msra.mxu1 %v111_v44  ;;  %268 = vmatpush.msra.mxu3 %v818_v48  ;;  %v842_v52 = vld [vmem:[%s1353_s4 + $0xf8] sm:$0xff]  ;;  %v854_v54 = vld [vmem:[%s1353_s4 + $0xf0] sm:$0xff]  ;;  %v874_v58 = vld [vmem:[%s1353_s4 + $0xe8] sm:$0xff] }
   0x7   :  { %v36_v7 = vrot.slane %v35_v6, 4  ;;  %291 = vmatpush.msrb.mxu2 %v825_v49  ;;  %v881_v59 = vld [vmem:[%s1353_s4 + $0x60] sm:$0xff]  ;;  %v893_v61 = vld [vmem:[%s1353_s4 + $0x58] sm:$0xff]  ;;  %v903_v63 = vld [vmem:[%s1353_s4 + $0x50] sm:$0xff] }
   0x8   :  { %314 = vmatpush.msrb.mxu3 %v830_v50  ;;  %378 = vmatpush.msrb.mxu1 %v842_v52  ;;  %v886_v60 = vld [vmem:[%s1353_s4 + $0xe0] sm:$0xff]  ;;  %v898_v62 = vld [vmem:[%s1353_s4 + $0xd8] sm:$0xff]  ;;  %v922_v2 = vld [vmem:[%s1353_s4 + $0xc8] sm:$0xff] }
   0x9   :  { %v37_v8 = vadd.f32 %v36_v7, %v35_v6  ;;  %v929_v3 = vld [vmem:[%s1353_s4 + $0x40] sm:$0xff]  ;;  %v946_v6 = vld [vmem:[%s1353_s4 + $0xb8] sm:$0xff] }
   0xa   :  { %379 = vmatpush.msrb.mxu1 %v854_v54  ;;  %v934_v4 = vld [vmem:[%s1353_s4 + $0xc0] sm:$0xff]  ;;  %1389 = vst [vmem:[#allocation6_spill] sm:$0xff] %v946_v6  ;;  %v951_v7 = vld [vmem:[%s1353_s4 + $0x178] sm:$0xff] }
   0xb   :  { %v38_v9 = vrot.slane %v37_v8, 2  ;;  %1388 = vst [vmem:[#allocation5_spill] sm:$0xff] %v934_v4  ;;  %v1042_v22 = vld [vmem:[%s1353_s4 + $0x98] sm:$0xff]  ;;  %v119_v44 = vld [vmem:[%s1352_s3] sm:$0xf] }
   0xc   :  { %380 = vmatpush.msrb.mxu1 %v874_v58  ;;  %1395 = vst [vmem:[#allocation12_spill] sm:$0xff] %v1042_v22 }
   0xd   :  { %30 = vadd.xlane.f32.xlu0 %v29_v5  ;;  %v39_v10 = vadd.f32 %v38_v9, %v37_v8  ;;  %v941_v5 = vld [vmem:[%s1353_s4 + $0x38] sm:$0xff]  ;;  %v965_v9 = vld [vmem:[%s1353_s4 + $0x30] sm:$0xff] }
   0xe   :  { %381 = vmatpush.msrb.mxu1 %v886_v60  ;;  %v958_v8 = vld [vmem:[%s1353_s4 + $0x1f8] sm:$0xff] }
   0xf   :  { %v40_v11 = vrot.slane %v39_v10, 1 }
  0x10   :  { %382 = vmatpush.msrb.mxu1 %v898_v62 }
  0x11   :  { %v41_v12 = vadd.f32 %v40_v11, %v39_v10  ;;  %v970_v10 = vld [vmem:[%s1353_s4 + $0xb0] sm:$0xff] }
  0x12   :  { %1390 = vst [vmem:[#allocation7_spill] sm:$0xff] %v970_v10  ;;  %v975_v11 = vld [vmem:[%s1353_s4 + $0x170] sm:$0xff] }
  0x13   :  { %718 = vrsqrt.f32 %v41_v12  ;;  %vm73_vm1 = vweird.f32 %v41_v12  ;;  %vm66_vm5 = vcmp.gt.f32.partialorder %v41_v12, 0.0 }
  0x19   :  { %v719_v13 = vpop.eup %718 }
  0x1a   :  { %v68_v14 = vmul.f32 %v719_v13, %v41_v12  ;;  %vm74_vm2 = vweird.f32 %v719_v13  ;;  %v982_v12 = vld [vmem:[%s1353_s4 + $0x1f0] sm:$0xff] }
  0x1b   :  { %vm75_vm3 = vmor %vm73_vm1, %vm74_vm2 }
  0x1c   :  { %v69_v16 = vmul.f32 %v719_v13, %v68_v14  ;;  %v994_v14 = vld [vmem:[%s1353_s4 + $0xa8] sm:$0xff] }
  0x1d   :  { %1391 = vst [vmem:[#allocation8_spill] sm:$0xff] %v994_v14 }
  0x1e   :  { %v70_v17 = vmul.f32 0.5, %v69_v16  ;;  %v1006_v16 = vld [vmem:[%s1353_s4 + $0x1e8] sm:$0xff] }
  0x20   :  { %v71_v21 = vsub.f32 1.5, %v70_v17  ;;  %v1013_v17 = vld [vmem:[%s1353_s4 + $0x20] sm:$0xff] }
  0x21   :  { %1392 = vst [vmem:[#allocation9_spill] sm:$0xff] %v1013_v17 }
  0x22   :  { %v72_v25 = vmul.f32 %v719_v13, %v71_v21  ;;  %v1037_v21 = vld [vmem:[%s1353_s4 + $0x18] sm:$0xff] }
  0x23   :  { %1394 = vst [vmem:[#allocation11_spill] sm:$0xff] %v1037_v21 }
  0x24   :  { %v76_v30 = vsel %vm75_vm3, %v719_v13, %v72_v25  ;;  %v989_v13 = vld [vmem:[%s1353_s4 + $0x28] sm:$0xff]  ;;  %v1059_v25 = vld [vmem:[%s1353_s4 + $0x10] sm:$0xff] }
  0x25   :  { %v77_v34 = vsel %vm66_vm5, %v76_v30, 0.0  ;;  %1396 = vst [vmem:[#allocation13_spill] sm:$0xff] %v1059_v25  ;;  %v1090_v30 = vld [vmem:[%s1353_s4 + $0x88] sm:$0xff] }
  0x26   :  { %1399 = vst [vmem:[#allocation16_spill] sm:$0xff] %v1090_v30 }
  0x78   :  { %v34_v15 = vpop.xlane.xlu0 %33 }
  0x79   :  { %720 = vrsqrt.f32 %v34_v15  ;;  %vm60_vm6 = vweird.f32 %v34_v15  ;;  %vm43_vm8 = vcmp.gt.f32.partialorder %v34_v15, 0.0 }
  0x7f   :  { %v721_v18 = vpop.eup %720 }
  0x80   :  { %v55_v19 = vmul.f32 %v721_v18, %v34_v15  ;;  %v31_v20 = vpop.xlane.xlu0 %30  ;;  %vm61_vm4 = vweird.f32 %v721_v18  ;;  %v999_v15 = vld [vmem:[%s1353_s4 + $0x168] sm:$0xff] }
  0x81   :  { %722 = vrsqrt.f32 %v31_v20  ;;  %vm62_vm7 = vmor %vm60_vm6, %vm61_vm4  ;;  %vm50_vm10 = vweird.f32 %v31_v20  ;;  %vm42_vm12 = vcmp.gt.f32.partialorder %v31_v20, 0.0 }
  0x82   :  { %v56_v23 = vmul.f32 %v721_v18, %v55_v19  ;;  %v1023_v19 = vld [vmem:[%s1353_s4 + $0x160] sm:$0xff] }
  0x84   :  { %v57_v24 = vmul.f32 0.5, %v56_v23  ;;  %v1047_v23 = vld [vmem:[%s1353_s4 + $0x158] sm:$0xff] }
  0x86   :  { %v58_v26 = vsub.f32 1.5, %v57_v24  ;;  %v1054_v24 = vld [vmem:[%s1353_s4 + $0x1d8] sm:$0xff] }
  0x87   :  { %v723_v27 = vpop.eup %722 }
  0x88   :  { %v45_v28 = vmul.f32 %v723_v27, %v31_v20  ;;  %v59_v29 = vmul.f32 %v721_v18, %v58_v26  ;;  %vm51_vm9 = vweird.f32 %v723_v27  ;;  %v1030_v20 = vld [vmem:[%s1353_s4 + $0x1e0] sm:$0xff]  ;;  %v1064_v26 = vld [vmem:[%s1353_s4 + $0x90] sm:$0xff] }
  0x89   :  { %vm52_vm11 = vmor %vm50_vm10, %vm51_vm9  ;;  %1397 = vst [vmem:[#allocation14_spill] sm:$0xff] %v1064_v26 }
  0x8a   :  { %v46_v31 = vmul.f32 %v723_v27, %v45_v28  ;;  %v63_v32 = vsel %vm62_vm7, %v721_v18, %v59_v29  ;;  %v1018_v18 = vld [vmem:[%s1353_s4 + $0xa0] sm:$0xff]  ;;  %v1076_v28 = vld [vmem:[%s1353_s4 + $0x1d0] sm:$0xff]  ;;  %v1085_v29 = vld [vmem:[%s1353_s4 + $0x8] sm:$0xff] }
  0x8b   :  { %v65_v33 = vsel %vm43_vm8, %v63_v32, 0.0  ;;  %1393 = vst [vmem:[#allocation10_spill] sm:$0xff] %v1018_v18  ;;  %v1102_v32 = vld [vmem:[%s1353_s4 + $0x1c8] sm:$0xff] }
  0x8c   :  { %v47_v35 = vmul.f32 0.5, %v46_v31  ;;  %v79_v36 = vmul.f32 %v65_v33, %v25_v0  ;;  %v910_v0 = vld [vmem:[%s1353_s4 + $0xd0] sm:$0xff]  ;;  %1398 = vst [vmem:[#allocation15_spill] sm:$0xff] %v1085_v29  ;;  %v1095_v31 = vld [vmem:[%s1353_s4 + $0x148] sm:$0xff]  ;;  %v1109_v33 = vld [vmem:[%s1353_s4] sm:$0xff] }
  0x8d   :  { %383 = vmatpush.msrb.mxu1 %v910_v0  ;;  %1400 = vst [vmem:[#allocation17_spill] sm:$0xff] %v1109_v33 }
  0x8e   :  { %v48_v37 = vsub.f32 1.5, %v47_v35  ;;  %v81_v38 = vmul.f32 %v79_v36, %v77_v34  ;;  %v1119_v35 = vld [vmem:[%s1353_s4 + $0x140] sm:$0xff] }
  0x8f   :  { %384 = vmatpush.msrb.mxu1 %v922_v2  ;;  %1402 = vst [vmem:[#allocation19_spill] sm:$0xff] %v1119_v35  ;;  %v1126_v36 = vld [vmem:[%s1353_s4 + $0x1c0] sm:$0xff] }
  0x90   :  { %v49_v39 = vmul.f32 %v723_v27, %v48_v37  ;;  %102 = vmatpush.msra.mxu0 %v81_v38  ;;  %v1133_v37 = vld [vmem:[%s1353_s4 + $0x138] sm:$0xff] }
  0x91   :  { %385 = vmatpush.msrb.mxu1 %v934_v4  ;;  %1403 = vst [vmem:[#allocation20_spill] sm:$0xff] %v1133_v37 }
  0x92   :  { %v53_v40 = vsel %vm52_vm11, %v723_v27, %v49_v39  ;;  %v1071_v27 = vld [vmem:[%s1353_s4 + $0x150] sm:$0xff] }
  0x93   :  { %v64_v41 = vsel %vm42_vm12, %v53_v40, 0.0  ;;  %386 = vmatpush.msrb.mxu1 %v946_v6  ;;  %v1145_v39 = vld [vmem:[%s1353_s4 + $0x130] sm:$0xff] }
  0x94   :  { %v78_v42 = vmul.f32 %v64_v41, %v24_v1  ;;  %v917_v1 = vld [vmem:[%s1353_s4 + $0x48] sm:$0xff]  ;;  %1404 = vst [vmem:[#allocation21_spill] sm:$0xff] %v1145_v39  ;;  %v1150_v40 = vld [vmem:[%s1353_s4 + $0x1b0] sm:$0xff]  ;;  %v114_v41 = vld [vmem:[%s1350_s1 + $0x18] sm:$0xff] }
  0x95   :  { %387 = vmatpush.msrb.mxu1 %v970_v10 }
  0x96   :  { %v80_v43 = vmul.f32 %v78_v42, %v77_v34  ;;  %v1114_v34 = vld [vmem:[%s1353_s4 + $0x80] sm:$0xff]  ;;  %v1160_v42 = vld [vmem:[%s1353_s4 + $0x128] sm:$0xff] }
  0x97   :  { %388 = vmatpush.msrb.mxu1 %v994_v14  ;;  %1401 = vst [vmem:[#allocation18_spill] sm:$0xff] %v1114_v34  ;;  %v1225_v14 = vld [vmem:[%s1353_s4 + $0x188] sm:$0xff] }
  0x98   :  { %103 = vmatpush.msra.mxu0 %v80_v43  ;;  %1405 = vst [vmem:[#allocation22_spill] sm:$0xff] %v1160_v42 }
  0x99   :  { %693 = vmatmul.msk.f32.vlgmr.msra.gmra.mxu0 %vm28_vm0, %v80_v43  ;;  %389 = vmatpush.msrb.mxu1 %v1018_v18  ;;  %v1165_v43 = vld [vmem:[%s1353_s4 + $0x1a8] sm:$0xff]  ;;  %v1199_v18 = vld [vmem:[%s1353_s4 + $0x198] sm:$0xff]  ;;  %1415 = vst [vmem:[#allocation32_spill] sm:$0xff] %v1225_v14 }
  0x9a   :  { %358 = vmatpush.msrb.mxu0 %v837_v51  ;;  %1411 = vst [vmem:[#allocation28_spill] sm:$0xff] %v1199_v18 }
  0x9b   :  { %390 = vmatpush.msrb.mxu1 %v1042_v22  ;;  %v1187_v22 = vperm.slane %v119_v44, 1 }
  0x9c   :  { %359 = vmatpush.msrb.mxu0 %v847_v53 }
  0x9d   :  { %391 = vmatpush.msrb.mxu1 %v1064_v26  ;;  %v1183_v26 = vld [vmem:[%s1353_s4 + $0x1a0] sm:$0xff]  ;;  %1409 = vst [vmem:[#allocation26_spill] sm:$0xff] %v1187_v22 }
  0x9e   :  { %360 = vmatpush.msrb.mxu0 %v869_v57  ;;  %1407 = vst [vmem:[#allocation24_spill] sm:$0xff] %v1183_v26 }
  0x9f   :  { %392 = vmatpush.msrb.mxu1 %v1090_v30  ;;  %v1178_v30 = vld [vmem:[%s1353_s4 + $0x120] sm:$0xff] }
  0xa0   :  { %361 = vmatpush.msrb.mxu0 %v881_v59  ;;  %1406 = vst [vmem:[#allocation23_spill] sm:$0xff] %v1178_v30 }
  0xa1   :  { %694 = vmatmul.msk.f32.gmra.mxu0 %vm28_vm0, %v81_v38  ;;  %393 = vmatpush.msrb.mxu1 %v1114_v34  ;;  %v1138_v38 = vld [vmem:[%s1353_s4 + $0x1b8] sm:$0xff]  ;;  %v113_v34 = vld [vmem:[%s1350_s1 + $0x10] sm:$0xff] }
  0xa2   :  { %362 = vmatpush.msrb.mxu0 %v893_v61 }
  0xa4   :  { %363 = vmatpush.msrb.mxu0 %v903_v63 }
  0xa6   :  { %364 = vmatpush.msrb.mxu0 %v917_v1 }
  0xa8   :  { %365 = vmatpush.msrb.mxu0 %v929_v3 }
  0xaa   :  { %366 = vmatpush.msrb.mxu0 %v941_v5 }
  0xac   :  { %367 = vmatpush.msrb.mxu0 %v965_v9 }
  0xae   :  { %368 = vmatpush.msrb.mxu0 %v989_v13 }
  0xb0   :  { %369 = vmatpush.msrb.mxu0 %v1013_v17 }
  0xb2   :  { %370 = vmatpush.msrb.mxu0 %v1037_v21 }
  0xb4   :  { %371 = vmatpush.msrb.mxu0 %v1059_v25 }
  0xb6   :  { %372 = vmatpush.msrb.mxu0 %v1085_v29 }
  0xb8   :  { %373 = vmatpush.msrb.mxu0 %v1109_v33  ;;  %v1194_v33 = vld [vmem:[%s1353_s4 + $0x118] sm:$0xff] }
  0xb9   :  { %1410 = vst [vmem:[#allocation27_spill] sm:$0xff] %v1194_v33 }
  0xba   :  { %453 = vmatpush.msra.mxu0 %v114_v41 }
  0xbc   :  { %454 = vmatpush.msra.mxu0 %v113_v34 }
 0x116   :  { %v802_v45 = vpop.f32.mrf.mxu0 }
 0x117   :  { %695 = vmatmul.msk.f32.vlgmr.msra.gmra.mxu1 %vm28_vm0, %v802_v45 }
 0x118   :  { %715 = vmatpush.msra.mxu1 %v114_v41  ;;  %v1185_v41 = vperm.slane %v119_v44, 0 }
 0x11a   :  { %716 = vmatpush.msra.mxu1 %v113_v34  ;;  %1408 = vst [vmem:[#allocation25_spill] sm:$0xff] %v1185_v41  ;;  %v1206_v34 = vld [vmem:[%s1353_s4 + $0x110] sm:$0xff] }
 0x11b   :  { %1412 = vst [vmem:[#allocation29_spill] sm:$0xff] %v1206_v34 }
 0x11e   :  { %v806_v46 = vpop.f32.mrf.mxu0 }
 0x11f   :  { %696 = vmatmul.msk.f32.gmra.mxu1 %vm28_vm0, %v806_v46 }
 0x194   :  { %v208_v55 = vpop.f32.mrf.mxu1 }
 0x195   :  { %697 = vmatmul.msk.f32.vlgmr.msra.gmra.mxu2 %vm223_vm13, %v208_v55  ;;  %699 = vmatmul.msk.f32.vlgmr.msra.gmra.mxu3 %vm223_vm13, %v208_v55 }
 0x196   :  { %398 = vmatpush.msra.mxu2 %v951_v7  ;;  %418 = vmatpush.msra.mxu3 %v958_v8 }
 0x198   :  { %399 = vmatpush.msra.mxu2 %v975_v11  ;;  %419 = vmatpush.msra.mxu3 %v982_v12 }
 0x19a   :  { %400 = vmatpush.msra.mxu2 %v999_v15  ;;  %420 = vmatpush.msra.mxu3 %v1006_v16 }
 0x19c   :  { %v211_v56 = vpop.f32.mrf.mxu1  ;;  %401 = vmatpush.msra.mxu2 %v1023_v19  ;;  %421 = vmatpush.msra.mxu3 %v1030_v20 }
 0x19d   :  { %698 = vmatmul.msk.f32.gmra.mxu2 %vm223_vm13, %v211_v56  ;;  %700 = vmatmul.msk.f32.gmra.mxu3 %vm223_vm13, %v211_v56 }
 0x19e   :  { %402 = vmatpush.msra.mxu2 %v1047_v23  ;;  %422 = vmatpush.msra.mxu3 %v1054_v24 }
 0x1a0   :  { %403 = vmatpush.msra.mxu2 %v1071_v27  ;;  %423 = vmatpush.msra.mxu3 %v1076_v28 }
 0x1a2   :  { %404 = vmatpush.msra.mxu2 %v1095_v31  ;;  %424 = vmatpush.msra.mxu3 %v1102_v32 }
 0x1a4   :  { %405 = vmatpush.msra.mxu2 %v1119_v35  ;;  %425 = vmatpush.msra.mxu3 %v1126_v36 }
 0x1a5   :  { %701 = vmatmul.msk.f32.vlgmr.msrb.gmra.mxu2 %vm223_vm13, %v208_v55  ;;  %703 = vmatmul.msk.f32.vlgmr.msrb.gmra.mxu3 %vm223_vm13, %v208_v55 }
 0x1a6   :  { %406 = vmatpush.msra.mxu2 %v1133_v37  ;;  %426 = vmatpush.msra.mxu3 %v1138_v38 }
 0x1a8   :  { %407 = vmatpush.msra.mxu2 %v1145_v39  ;;  %427 = vmatpush.msra.mxu3 %v1150_v40 }
 0x1aa   :  { %408 = vmatpush.msra.mxu2 %v1160_v42  ;;  %428 = vmatpush.msra.mxu3 %v1165_v43 }
 0x1ac   :  { %409 = vmatpush.msra.mxu2 %v1178_v30  ;;  %429 = vmatpush.msra.mxu3 %v1183_v26  ;;  %v1211_v30 = vld [vmem:[%s1353_s4 + $0x190] sm:$0xff] }
 0x1ad   :  { %702 = vmatmul.msk.f32.gmra.mxu2 %vm223_vm13, %v211_v56  ;;  %704 = vmatmul.msk.f32.gmra.mxu3 %vm223_vm13, %v211_v56  ;;  %1413 = vst [vmem:[#allocation30_spill] sm:$0xff] %v1211_v30 }
 0x1ae   :  { %410 = vmatpush.msra.mxu2 %v1194_v33  ;;  %430 = vmatpush.msra.mxu3 %v1199_v18  ;;  %v1220_v33 = vld [vmem:[%s1353_s4 + $0x108] sm:$0xff] }
 0x1af   :  { %1414 = vst [vmem:[#allocation31_spill] sm:$0xff] %v1220_v33 }
 0x1b0   :  { %411 = vmatpush.msra.mxu2 %v1206_v34  ;;  %431 = vmatpush.msra.mxu3 %v1211_v30 }
 0x1b2   :  { %412 = vmatpush.msra.mxu2 %v1220_v33  ;;  %432 = vmatpush.msra.mxu3 %v1225_v14 }
 0x218   :  { %v247_v55 = vpop.f32.mrf.mxu2  ;;  %v270_v56 = vpop.f32.mrf.mxu3 }
 0x219   :  { %v248_v29 = vadd.f32 %v247_v55, %v1185_v41  ;;  %v271_v42 = vadd.f32 %v270_v56, %v1187_v22  ;;  %v1230_v55 = vld [vmem:[%s1353_s4 + $0x100] sm:$0xff] }
 0x21a   :  { %1416 = vst [vmem:[#allocation33_spill] sm:$0xff] %v1230_v55  ;;  %v1235_v56 = vld [vmem:[%s1353_s4 + $0x180] sm:$0xff]  ;;  %413 = vmatpush.msra.mxu2 %v1230_v55 }
 0x21b   :  { %1417 = vst [vmem:[#allocation34_spill] sm:$0xff] %v1235_v56  ;;  %v322_v10 = vmax.f32 %v248_v29, 0.0  ;;  %v323_v18 = vmax.f32 %v271_v42, 0.0  ;;  %433 = vmatpush.msra.mxu3 %v1235_v56 }
 0x21c   :  { %506 = vmatpush.msrb.mxu2 %v818_v48 }
 0x21d   :  { %529 = vmatpush.msrb.mxu3 %v825_v49 }
 0x220   :  { %v250_v25 = vpop.f32.mrf.mxu2  ;;  %v273_v39 = vpop.f32.mrf.mxu3 }
 0x221   :  { %v251_v34 = vadd.f32 %v250_v25, %v1185_v41  ;;  %v274_v30 = vadd.f32 %v273_v39, %v1187_v22 }
 0x223   :  { %v326_v21 = vmax.f32 %v251_v34, 0.0  ;;  %v327_v37 = vmax.f32 %v274_v30, 0.0  ;;  %v1245_v34 = vperm.slane %v119_v44, 2  ;;  %v1247_v30 = vperm.slane %v119_v44, 3 }
 0x225   :  { %v330_v6 = vadd.f32 %v326_v21, %v322_v10  ;;  %v337_v25 = vadd.f32 %v327_v37, %v323_v18 }
 0x227   :  { %v331_v41 = vrot.slane %v330_v6, 4  ;;  %v338_v39 = vrot.slane %v337_v25, 4 }
 0x228   :  { %v293_v22 = vpop.f32.mrf.mxu2  ;;  %v316_v33 = vpop.f32.mrf.mxu3 }
 0x229   :  { %v332_v26 = vadd.f32 %v331_v41, %v330_v6  ;;  %v339_v14 = vadd.f32 %v338_v39, %v337_v25  ;;  %v294_v48 = vadd.f32 %v293_v22, %v1245_v34  ;;  %v317_v49 = vadd.f32 %v316_v33, %v1247_v30 }
 0x22b   :  { %v333_v29 = vrot.slane %v332_v26, 2  ;;  %v340_v42 = vrot.slane %v339_v14, 2  ;;  %v324_v39 = vmax.f32 %v294_v48, 0.0  ;;  %v325_v35 = vmax.f32 %v317_v49, 0.0 }
 0x22d   :  { %v334_v55 = vadd.f32 %v333_v29, %v332_v26  ;;  %v341_v56 = vadd.f32 %v340_v42, %v339_v14 }
 0x22f   :  { %v335_v10 = vrot.slane %v334_v55, 1  ;;  %v342_v18 = vrot.slane %v341_v56, 1 }
 0x230   :  { %v296_v21 = vpop.f32.mrf.mxu2  ;;  %v319_v37 = vpop.f32.mrf.mxu3 }
 0x231   :  { %v297_v17 = vadd.f32 %v296_v21, %v1245_v34  ;;  %v320_v6 = vadd.f32 %v319_v37, %v1247_v30  ;;  %v336_v41 = vadd.f32 %v335_v10, %v334_v55  ;;  %v343_v25 = vadd.f32 %v342_v18, %v341_v56  ;;  %v1446_v18 = vld [vmem:[#allocation25_spill] sm:$0xff] }
 0x233   :  { %v328_v44 = vmax.f32 %v297_v17, 0.0  ;;  %v329_v4 = vmax.f32 %v320_v6, 0.0  ;;  %374 = vmatmul.f32.vlgmr.msrb.gmra.mxu0 %v336_v41  ;;  %394 = vmatmul.f32.vlgmr.msrb.gmra.mxu1 %v343_v25 }
 0x234   :  { %483 = vmatpush.msrb.mxu1 %v813_v47  ;;  %552 = vmatpush.msrb.mxu0 %v830_v50 }
 0x235   :  { %v344_v14 = vadd.f32 %v328_v44, %v324_v39  ;;  %v351_v22 = vadd.f32 %v329_v4, %v325_v35 }
 0x237   :  { %v345_v26 = vrot.slane %v344_v14, 4  ;;  %v352_v33 = vrot.slane %v351_v22, 4 }
 0x239   :  { %v346_v29 = vadd.f32 %v345_v26, %v344_v14  ;;  %v353_v42 = vadd.f32 %v352_v33, %v351_v22 }
 0x23b   :  { %v347_v21 = vrot.slane %v346_v29, 2  ;;  %v354_v37 = vrot.slane %v353_v42, 2  ;;  %705 = vmatmul.msk.f32.vlgmr.msra.gmra.mxu0 %vm28_vm0, %v802_v45  ;;  %706 = vmatmul.msk.f32.vlgmr.msra.gmra.mxu1 %vm28_vm0, %v806_v46  ;;  %v1418_v46 = vld [vmem:[#allocation5_spill] sm:$0xff] }
 0x23c   :  { %596 = vmatpush.msra.mxu1 %v837_v51  ;;  %656 = vmatpush.msra.mxu0 %v958_v8  ;;  %v1419_v51 = vld [vmem:[#allocation19_spill] sm:$0xff]  ;;  %v1436_v8 = vld [vmem:[#allocation17_spill] sm:$0xff] }
 0x23d   :  { %v348_v47 = vadd.f32 %v347_v21, %v346_v29  ;;  %v355_v50 = vadd.f32 %v354_v37, %v353_v42  ;;  %v1447_v21 = vld [vmem:[#allocation26_spill] sm:$0xff] }
 0x23e   :  { %597 = vmatpush.msra.mxu1 %v847_v53  ;;  %657 = vmatpush.msra.mxu0 %v982_v12  ;;  %v1421_v53 = vld [vmem:[#allocation24_spill] sm:$0xff]  ;;  %v1439_v12 = vld [vmem:[#allocation27_spill] sm:$0xff] }
 0x23f   :  { %v349_v4 = vrot.slane %v348_v47, 1  ;;  %v356_v17 = vrot.slane %v355_v50, 1 }
 0x240   :  { %598 = vmatpush.msra.mxu1 %v869_v57  ;;  %658 = vmatpush.msra.mxu0 %v1006_v16  ;;  %v1423_v57 = vld [vmem:[#allocation20_spill] sm:$0xff] }
 0x241   :  { %v350_v45 = vadd.f32 %v349_v4, %v348_v47  ;;  %v357_v35 = vadd.f32 %v356_v17, %v355_v50  ;;  %v1442_v16 = vld [vmem:[#allocation16_spill] sm:$0xff] }
 0x242   :  { %599 = vmatpush.msra.mxu1 %v881_v59  ;;  %659 = vmatpush.msra.mxu0 %v1030_v20  ;;  %v1425_v59 = vld [vmem:[#allocation28_spill] sm:$0xff]  ;;  %v1444_v20 = vld [vmem:[#allocation18_spill] sm:$0xff] }
 0x243   :  { %414 = vmatmul.f32.vlgmr.msra.gmra.mxu2 %v350_v45  ;;  %434 = vmatmul.f32.vlgmr.msra.gmra.mxu3 %v357_v35 }
 0x244   :  { %616 = vmatpush.msra.mxu2 %v842_v52  ;;  %636 = vmatpush.msra.mxu3 %v951_v7  ;;  %v1420_v52 = vld [vmem:[#allocation9_spill] sm:$0xff]  ;;  %v1435_v7 = vld [vmem:[#allocation23_spill] sm:$0xff] }
 0x245   :  { %600 = vmatpush.msra.mxu1 %v893_v61  ;;  %660 = vmatpush.msra.mxu0 %v1054_v24  ;;  %v1427_v61 = vld [vmem:[#allocation21_spill] sm:$0xff] }
 0x246   :  { %617 = vmatpush.msra.mxu2 %v854_v54  ;;  %637 = vmatpush.msra.mxu3 %v975_v11  ;;  %v1422_v54 = vld [vmem:[#allocation6_spill] sm:$0xff]  ;;  %v1438_v11 = vld [vmem:[#allocation12_spill] sm:$0xff] }
 0x247   :  { %601 = vmatpush.msra.mxu1 %v903_v63  ;;  %661 = vmatpush.msra.mxu0 %v1076_v28  ;;  %v1429_v63 = vld [vmem:[#allocation30_spill] sm:$0xff] }
 0x248   :  { %618 = vmatpush.msra.mxu2 %v874_v58  ;;  %638 = vmatpush.msra.mxu3 %v999_v15  ;;  %v1424_v58 = vld [vmem:[#allocation11_spill] sm:$0xff]  ;;  %v1441_v15 = vld [vmem:[#allocation29_spill] sm:$0xff] }
 0x249   :  { %602 = vmatpush.msra.mxu1 %v917_v1  ;;  %662 = vmatpush.msra.mxu0 %v1102_v32  ;;  %v1431_v1 = vld [vmem:[#allocation22_spill] sm:$0xff] }
 0x24a   :  { %619 = vmatpush.msra.mxu2 %v886_v60  ;;  %639 = vmatpush.msra.mxu3 %v1023_v19  ;;  %v1426_v60 = vld [vmem:[#allocation7_spill] sm:$0xff] }
 0x24b   :  { %603 = vmatpush.msra.mxu1 %v929_v3  ;;  %663 = vmatpush.msra.mxu0 %v1126_v36  ;;  %v1433_v3 = vld [vmem:[#allocation32_spill] sm:$0xff]  ;;  %v1443_v19 = vld [vmem:[#allocation31_spill] sm:$0xff] }
 0x24c   :  { %620 = vmatpush.msra.mxu2 %v898_v62  ;;  %640 = vmatpush.msra.mxu3 %v1047_v23  ;;  %v1428_v62 = vld [vmem:[#allocation13_spill] sm:$0xff] }
 0x24d   :  { %604 = vmatpush.msra.mxu1 %v941_v5  ;;  %664 = vmatpush.msra.mxu0 %v1138_v38  ;;  %v1434_v5 = vld [vmem:[#allocation10_spill] sm:$0xff]  ;;  %v1445_v23 = vld [vmem:[#allocation33_spill] sm:$0xff] }
 0x24e   :  { %621 = vmatpush.msra.mxu2 %v910_v0  ;;  %641 = vmatpush.msra.mxu3 %v1071_v27  ;;  %v1430_v0 = vld [vmem:[#allocation8_spill] sm:$0xff] }
 0x24f   :  { %605 = vmatpush.msra.mxu1 %v965_v9  ;;  %665 = vmatpush.msra.mxu0 %v1150_v40  ;;  %v1437_v9 = vld [vmem:[#allocation34_spill] sm:$0xff] }
 0x250   :  { %622 = vmatpush.msra.mxu2 %v922_v2  ;;  %642 = vmatpush.msra.mxu3 %v1095_v31  ;;  %v1432_v2 = vld [vmem:[#allocation15_spill] sm:$0xff]  ;;  %v1330_v31 = vld [vmem:[%s1354_s5] sm:$0x1]  ;;  %s750_s5 = smov [#allocation2]  }
 0x251   :  { %606 = vmatpush.msra.mxu1 %v989_v13  ;;  %666 = vmatpush.msra.mxu0 %v1165_v43  ;;  %v1440_v13 = vld [vmem:[#allocation14_spill] sm:$0xff]  ;;  %s682_s15 = sshll.u32 %s750_s5, 4  ;;  %s683_s15 = int_to_ptr.vmem [resolvable:$true] %s682_s15 }
 0x252   :  { %623 = vmatpush.msra.mxu2 %v1418_v46  ;;  %643 = vmatpush.msra.mxu3 %v1419_v51 }
 0x253   :  { %607 = vmatpush.msra.mxu1 %v1420_v52  ;;  %667 = vmatpush.msra.mxu0 %v1421_v53 }
 0x254   :  { %624 = vmatpush.msra.mxu2 %v1422_v54  ;;  %644 = vmatpush.msra.mxu3 %v1423_v57 }
 0x255   :  { %608 = vmatpush.msra.mxu1 %v1424_v58  ;;  %668 = vmatpush.msra.mxu0 %v1425_v59 }
 0x256   :  { %625 = vmatpush.msra.mxu2 %v1426_v60  ;;  %645 = vmatpush.msra.mxu3 %v1427_v61 }
 0x257   :  { %609 = vmatpush.msra.mxu1 %v1428_v62  ;;  %669 = vmatpush.msra.mxu0 %v1429_v63 }
 0x258   :  { %626 = vmatpush.msra.mxu2 %v1430_v0  ;;  %646 = vmatpush.msra.mxu3 %v1431_v1 }
 0x259   :  { %610 = vmatpush.msra.mxu1 %v1432_v2  ;;  %670 = vmatpush.msra.mxu0 %v1433_v3 }
 0x25a   :  { %627 = vmatpush.msra.mxu2 %v1434_v5  ;;  %647 = vmatpush.msra.mxu3 %v1435_v7 }
 0x25b   :  { %611 = vmatpush.msra.mxu1 %v1436_v8  ;;  %671 = vmatpush.msra.mxu0 %v1437_v9 }
 0x25c   :  { %628 = vmatpush.msra.mxu2 %v1438_v11  ;;  %648 = vmatpush.msra.mxu3 %v1439_v12 }
 0x25e   :  { %629 = vmatpush.msra.mxu2 %v1440_v13  ;;  %649 = vmatpush.msra.mxu3 %v1441_v15 }
 0x260   :  { %630 = vmatpush.msra.mxu2 %v1442_v16  ;;  %650 = vmatpush.msra.mxu3 %v1443_v19 }
 0x262   :  { %631 = vmatpush.msra.mxu2 %v1444_v20  ;;  %651 = vmatpush.msra.mxu3 %v1445_v23 }
 0x2b0   :  { %v375_v24 = vpop.f32.mrf.mxu0  ;;  %v395_v27 = vpop.f32.mrf.mxu1 }
 0x2b1   :  { %v376_v36 = vadd.f32 %v375_v24, %v1330_v31 }
 0x2b3   :  { %v396_v38 = vadd.f32 %v395_v27, %v376_v36 }
 0x2b8   :  { %v456_v28 = vpop.f32.mrf.mxu0  ;;  %v459_v32 = vpop.f32.mrf.mxu1 }
 0x2b9   :  { %707 = vmatmul.msk.f32.vlgmr.msrb.gmra.mxu1 %vm223_vm13, %v456_v28  ;;  %709 = vmatmul.msk.f32.vlgmr.msrb.gmra.mxu2 %vm223_vm13, %v456_v28 }
 0x2ba   :  { %711 = vmatmul.msk.f32.vlgmr.msrb.gmra.mxu3 %vm223_vm13, %v456_v28  ;;  %713 = vmatmul.msk.f32.vlgmr.msrb.gmra.mxu0 %vm223_vm13, %v456_v28 }
 0x2c1   :  { %708 = vmatmul.msk.f32.gmra.mxu1 %vm223_vm13, %v459_v32  ;;  %710 = vmatmul.msk.f32.gmra.mxu2 %vm223_vm13, %v459_v32 }
 0x2c2   :  { %712 = vmatmul.msk.f32.gmra.mxu3 %vm223_vm13, %v459_v32  ;;  %714 = vmatmul.msk.f32.gmra.mxu0 %vm223_vm13, %v459_v32 }
 0x2c6   :  { %v415_v40 = vpop.f32.mrf.mxu2  ;;  %v435_v55 = vpop.f32.mrf.mxu3 }
 0x2c7   :  { %v416_v43 = vadd.f32 %v415_v40, %v396_v38 }
 0x2c9   :  { %v436_v56 = vadd.f32 %v435_v55, %v416_v43 }
 0x2cb   :  { %438 = vst [vmem:[#allocation2] sm:$0x1] %v436_v56 }
 0x336   :  { %v485_v48 = vpop.f32.mrf.mxu1 }
 0x337   :  { %v554_v49 = vpop.f32.mrf.mxu0  ;;  %v486_v6 = vadd.f32 %v485_v48, %v1446_v18 }
 0x338   :  { %v555_v25 = vadd.f32 %v554_v49, %v1247_v30 }
 0x339   :  { %v560_v26 = vmax.f32 %v486_v6, 0.0 }
 0x33a   :  { %v563_v29 = vmax.f32 %v555_v25, 0.0 }
 0x33c   :  { %v508_v10 = vpop.f32.mrf.mxu2 }
 0x33d   :  { %v531_v41 = vpop.f32.mrf.mxu3  ;;  %v509_v37 = vadd.f32 %v508_v10, %v1447_v21 }
 0x33e   :  { %v488_v39 = vpop.f32.mrf.mxu1  ;;  %v532_v50 = vadd.f32 %v531_v41, %v1245_v34 }
 0x33f   :  { %v489_v44 = vadd.f32 %v488_v39, %v1446_v18  ;;  %v557_v14 = vpop.f32.mrf.mxu0  ;;  %v561_v53 = vmax.f32 %v509_v37, 0.0 }
 0x340   :  { %v558_v22 = vadd.f32 %v557_v14, %v1247_v30  ;;  %v562_v57 = vmax.f32 %v532_v50, 0.0 }
 0x341   :  { %v564_v33 = vmax.f32 %v489_v44, 0.0 }
 0x342   :  { %v567_v42 = vmax.f32 %v558_v22, 0.0 }
 0x343   :  { %v568_v47 = vadd.f32 %v564_v33, %v560_v26 }
 0x344   :  { %v589_v4 = vadd.f32 %v567_v42, %v563_v29  ;;  %v511_v17 = vpop.f32.mrf.mxu2 }
 0x345   :  { %v569_v45 = vrot.slane %v568_v47, 4  ;;  %v512_v35 = vadd.f32 %v511_v17, %v1447_v21  ;;  %v534_v46 = vpop.f32.mrf.mxu3 }
 0x346   :  { %v590_v51 = vrot.slane %v589_v4, 4  ;;  %v535_v52 = vadd.f32 %v534_v46, %v1245_v34 }
 0x347   :  { %v570_v30 = vadd.f32 %v569_v45, %v568_v47  ;;  %v565_v54 = vmax.f32 %v512_v35, 0.0 }
 0x348   :  { %v591_v58 = vadd.f32 %v590_v51, %v589_v4  ;;  %v566_v59 = vmax.f32 %v535_v52, 0.0 }
 0x349   :  { %v571_v60 = vrot.slane %v570_v30, 2  ;;  %v575_v61 = vadd.f32 %v565_v54, %v561_v53 }
 0x34a   :  { %v592_v62 = vrot.slane %v591_v58, 2  ;;  %v582_v63 = vadd.f32 %v566_v59, %v562_v57 }
 0x34b   :  { %v572_v0 = vadd.f32 %v571_v60, %v570_v30  ;;  %v576_v1 = vrot.slane %v575_v61, 4 }
 0x34c   :  { %v593_v2 = vadd.f32 %v592_v62, %v591_v58  ;;  %v583_v3 = vrot.slane %v582_v63, 4 }
 0x34d   :  { %v573_v5 = vrot.slane %v572_v0, 1  ;;  %v577_v7 = vadd.f32 %v576_v1, %v575_v61 }
 0x34e   :  { %v594_v8 = vrot.slane %v593_v2, 1  ;;  %v584_v9 = vadd.f32 %v583_v3, %v582_v63 }
 0x34f   :  { %v578_v11 = vrot.slane %v577_v7, 2  ;;  %v574_v34 = vadd.f32 %v573_v5, %v572_v0 }
 0x350   :  { %v585_v12 = vrot.slane %v584_v9, 2  ;;  %v595_v13 = vadd.f32 %v594_v8, %v593_v2 }
 0x351   :  { %v579_v15 = vadd.f32 %v578_v11, %v577_v7  ;;  %612 = vmatmul.f32.vlgmr.msra.gmra.mxu1 %v574_v34 }
 0x352   :  { %v586_v16 = vadd.f32 %v585_v12, %v584_v9  ;;  %672 = vmatmul.f32.vlgmr.msra.gmra.mxu0 %v595_v13 }
 0x353   :  { %v580_v19 = vrot.slane %v579_v15, 1 }
 0x354   :  { %v587_v20 = vrot.slane %v586_v16, 1 }
 0x355   :  { %v581_v23 = vadd.f32 %v580_v19, %v579_v15 }
 0x356   :  { %v588_v24 = vadd.f32 %v587_v20, %v586_v16 }
 0x357   :  { %632 = vmatmul.f32.vlgmr.msra.gmra.mxu2 %v581_v23 }
 0x358   :  { %652 = vmatmul.f32.vlgmr.msra.gmra.mxu3 %v588_v24 }
 0x3ce   :  { %v613_v27 = vpop.f32.mrf.mxu1 }
 0x3cf   :  { %v614_v28 = vadd.f32 %v613_v27, %v1330_v31  ;;  %v673_v43 = vpop.f32.mrf.mxu0 }
 0x3da   :  { %v633_v32 = vpop.f32.mrf.mxu2 }
 0x3db   :  { %v634_v36 = vadd.f32 %v633_v32, %v614_v28  ;;  %v653_v38 = vpop.f32.mrf.mxu3 }
 0x3dd   :  { %v654_v40 = vadd.f32 %v653_v38, %v634_v36 }
 0x3df   :  { %v674_v55 = vadd.f32 %v673_v43, %v654_v40 }
 0x3e1   :  { %676 = vst [vmem:[#allocation2 + $0x1] sm:$0x1] %v674_v55 }
 0x3e2   :  { %687 = dma.vmem_to_hbm [thread:$0]  %s683_s15, 32, %s685_s2, [#allocation3]  }
 0x3e3   :  { %748 = dma.done.wait [#allocation3], 32  }
 0x3e4   :  { %749 = vsyncadd [#allocation3], 4294967264 }
 0x3e5   :  { %692 = vsyncpa [#allocation3], 1 }

</bundles_post_ra>
